<compile_context>
chip_gen: v7x
topology: tpu7x:2x2x1
jax: 0.10.0
libtpu: 0.0.40
codegen_flags: <defaults>
</compile_context>

<pallas_src>
from functools import partial

import jax
import jax.numpy as jnp
from jax.experimental import pallas as pl
from jax.experimental.pallas import tpu as pltpu

# ----------------------------- config ---------------------------------------
DIH_IDX  = (0, 1, 2, 3)   # atom indices (within input_ag) defining the dihedral
FEAT_PAD = 8              # feature rows in the slab: [cos, sin, 1 (bias), 0 x 5]
EPS      = 1e-30          # radius^2 clamp for degenerate dihedrals / padded rows


def _round_up(n, m):
    return ((n + m - 1) // m) * m


# ----------------------------- Pallas kernel --------------------------------
def molann_kernel(x_ref, p1_ref, w2_ref, o_ref, g_ref, cs_ref):
    """One batch tile.

    x_ref : (12, NB, 128)    coordinate rows (3*atom + xyz); batch folded onto
                             (sublane, lane) -> geometry ops are full vregs.
    p1_ref: (HPAD, 8)        layer-1 params, columns [w1[0], w1[1], b1, 0...].
    w2_ref: (OUT_PAD, 8+HPAD) layer-2 weights; column 2 = b2 (bias rides matmul).
    o_ref : (OUT_PAD, Bt)    lane-dense output tile.
    g_ref : (8+HPAD, Bt)     scratch: rows 0:8 feature slab, rows 8: hidden acts.
    cs_ref: (2, NB, 128)     scratch holding the folded cos/sin rows.
    """
    x = x_ref[...]                         # (12, NB, 128)
    nb = x_ref.shape[1]
    bt = o_ref.shape[1]

    def c(a, i):                           # (NB, 128) coordinate slab of atom a
        return x[3 * a + i]

    # bond vectors (full-occupancy VPU ops)
    r12x, r12y, r12z = c(1, 0) - c(0, 0), c(1, 1) - c(0, 1), c(1, 2) - c(0, 2)
    r23x, r23y, r23z = c(2, 0) - c(1, 0), c(2, 1) - c(1, 1), c(2, 2) - c(1, 2)
    r34x, r34y, r34z = c(3, 0) - c(2, 0), c(3, 1) - c(2, 1), c(3, 2) - c(2, 2)

    # cross products n1 = r12 x r23, n2 = r23 x r34 (elementwise, no XLU)
    n1x = r12y * r23z - r12z * r23y
    n1y = r12z * r23x - r12x * r23z
    n1z = r12x * r23y - r12y * r23x
    n2x = r23y * r34z - r23z * r34y
    n2y = r23z * r34x - r23x * r34z
    n2z = r23x * r34y - r23y * r34x

    cos_phi = n1x * n2x + n1y * n2y + n1z * n2z
    norm23  = jnp.sqrt(r23x * r23x + r23y * r23y + r23z * r23z)
    sin_phi = (n1x * r34x + n1y * r34y + n1z * r34z) * norm23

    # unit-circle normalization: one EUP rsqrt instead of sqrt + two divides
    inv_r = jax.lax.rsqrt(jnp.maximum(cos_phi * cos_phi + sin_phi * sin_phi, EPS))
    cs_ref[0] = cos_phi * inv_r            # (NB, 128) folded
    cs_ref[1] = sin_phi * inv_r

    # constant feature rows.  Re-written every step: cheap, and megacore-safe
    # (each core has its own scratch).  Rows 3:8 MUST be finite because both
    # matmuls contract over them (with zero weights) and 0 * garbage-NaN = NaN.
    g_ref[2:3, :] = jnp.ones((1, bt), jnp.float32)            # bias rail
    g_ref[3:FEAT_PAD, :] = jnp.zeros((FEAT_PAD - 3, bt), jnp.float32)

    # relayout only the two result rows: folded (NB,128) -> lane-major (1, Bt)
    for s in range(nb):                    # static unroll, NB = Bt // 128
        g_ref[0:1, s * 128:(s + 1) * 128] = cs_ref[0, s:s + 1, :]
        g_ref[1:2, s * 128:(s + 1) * 128] = cs_ref[1, s:s + 1, :]

    # ann_layers layer 1 on the MXU: (HPAD, 8) @ (8, Bt); tanh on the EUP
    hpre = jnp.dot(p1_ref[...], g_ref[0:FEAT_PAD, :],
                   preferred_element_type=jnp.float32)
    g_ref[FEAT_PAD:, :] = jnp.tanh(hpre)

    # ann_layers layer 2 (+ bias via the ones row): one MXU matmul into a
    # lane-dense (OUT_PAD, Bt) output tile (unmasked stores)
    o_ref[...] = jnp.dot(w2_ref[...], g_ref[...],
                         preferred_element_type=jnp.float32)


# ----------------------------- parameter packing (hoisted, once) ------------
def prepare_params(w1, b1, w2, b2):
    """w1: (2, HIDDEN), b1: (HIDDEN,), w2: (HIDDEN, OUT), b2: (OUT,)."""
    feat, hidden = w1.shape
    out_dim = w2.shape[1]
    assert feat == 2 and w2.shape[0] == hidden
    hpad = _round_up(hidden, 8)            # NOT 128: MXU only needs K % 8 == 0
    opad = _round_up(out_dim, 8)

    p1 = jnp.zeros((hpad, FEAT_PAD), jnp.float32)
    p1 = p1.at[:hidden, 0].set(w1[0])
    p1 = p1.at[:hidden, 1].set(w1[1])
    p1 = p1.at[:hidden, 2].set(b1)

    w2aug = jnp.zeros((opad, FEAT_PAD + hpad), jnp.float32)
    w2aug = w2aug.at[:out_dim, 2].set(b2)                          # bias column
    w2aug = w2aug.at[:out_dim, FEAT_PAD:FEAT_PAD + hidden].set(w2.T)
    return p1, w2aug, out_dim


# ----------------------------- input packing --------------------------------
def pack_dihedral_input(x, block_b):
    """(B, N_atoms, 3) -> ((12, Bpad//128, 128) folded layout, Bpad).

    One gather + one transpose pass over 12*B floats; if the upstream producer
    can emit this layout directly, the pass disappears.
    """
    B = x.shape[0]
    bp = pl.cdiv(B, block_b) * block_b
    xd = x[:, jnp.array(DIH_IDX), :].reshape(B, 12)        # gather dihedral atoms
    xd = jnp.pad(xd, ((0, bp - B), (0, 0)))                # pad batch (zeros)
    return xd.T.reshape(12, bp // 128, 128), bp            # reshape is free


# ----------------------------- forward wrapper -------------------------------
@partial(jax.jit, static_argnames=("out_dim", "block_b"))
def molann_forward(x, p1, w2aug, *, out_dim, block_b=1024):
    """x: (B, N_ATOMS, 3) float32 -> (B, out_dim) float32."""
    assert block_b % 1024 == 0, "block_b must keep the (Bt/128, 128) block sublane-tiled"
    hpad = p1.shape[0]
    opad = w2aug.shape[0]
    assert w2aug.shape[1] == FEAT_PAD + hpad

    x_f, bp = pack_dihedral_input(x, block_b)
    nb_tile = block_b // 128
    grid = (bp // block_b,)        # >= 2 tiles at B >= 2048: v7x megacore splits them

    out_t = pl.pallas_call(
        molann_kernel,
        out_shape=jax.ShapeDtypeStruct((opad, bp), jnp.float32),
        grid=grid,
        in_specs=[
            pl.BlockSpec((12, nb_tile, 128), lambda i: (0, i, 0)),    # x tile (folded)
            pl.BlockSpec((hpad, FEAT_PAD), lambda i: (0, 0)),         # layer-1 params (resident)
            pl.BlockSpec((opad, FEAT_PAD + hpad), lambda i: (0, 0)),  # layer-2 + bias (resident)
        ],
        out_specs=pl.BlockSpec((opad, block_b), lambda i: (0, i)),
        scratch_shapes=[
            pltpu.VMEM((FEAT_PAD + hpad, block_b), jnp.float32),      # [feat; hidden] slab
            pltpu.VMEM((2, nb_tile, 128), jnp.float32),               # folded cos/sin
        ],
        compiler_params=pltpu.CompilerParams(
            dimension_semantics=("parallel",)),
    )(x_f, p1, w2aug)

    return out_t[:out_dim, :x.shape[0]].T      # tiny (out_dim, B) transpose


# ----------------------------- pure-JAX reference ----------------------------
def molann_reference(x, w1, b1, w2, b2):
    a0, a1, a2, a3 = (x[:, i, :] for i in DIH_IDX)
    r12, r23, r34 = a1 - a0, a2 - a1, a3 - a2
    n1 = jnp.cross(r12, r23)
    n2 = jnp.cross(r23, r34)
    cos_phi = jnp.sum(n1 * n2, axis=1, keepdims=True)
    sin_phi = jnp.sum(n1 * r34, axis=1, keepdims=True) * \
        jnp.linalg.norm(r23, axis=1, keepdims=True)
    radius = jnp.sqrt(cos_phi ** 2 + sin_phi ** 2)
    feat = jnp.concatenate([cos_phi / radius, sin_phi / radius], axis=1)
    h = jnp.tanh(feat @ w1 + b1)
    return h @ w2 + b2


# ----------------------------- main ------------------------------------------
if __name__ == "__main__":
    key = jax.random.PRNGKey(0)
    kx, k1, k2, k3, k4 = jax.random.split(key, 5)

    B, N_ATOMS = 2048, 7          # batched: amortizes launch/DMA overhead
    FEAT, HIDDEN, OUT = 2, 32, 3

    x = jax.random.normal(kx, (B, N_ATOMS, 3), dtype=jnp.float32)
    lim1 = 1.0 / jnp.sqrt(FEAT)
    lim2 = 1.0 / jnp.sqrt(HIDDEN)
    w1 = jax.random.uniform(k1, (FEAT, HIDDEN), jnp.float32, -lim1, lim1)
    b1 = jax.random.uniform(k2, (HIDDEN,), jnp.float32, -lim1, lim1)
    w2 = jax.random.uniform(k3, (HIDDEN, OUT), jnp.float32, -lim2, lim2)
    b2 = jax.random.uniform(k4, (OUT,), jnp.float32, -lim2, lim2)

    # hoisted once at model-setup time (not per forward call)
    p1, w2aug, out_dim = prepare_params(w1, b1, w2, b2)

    out = molann_forward(x, p1, w2aug, out_dim=out_dim, block_b=1024)
    out = jax.block_until_ready(out)

    ref = molann_reference(x, w1, b1, w2, b2)
    assert out.shape == (B, OUT)
    assert bool(jnp.allclose(out, ref, atol=1e-4, rtol=1e-4)), "mismatch vs reference"

    print("KERNEL_OK")
</pallas_src>

<mosaic_0001>
module attributes {stable_mosaic.version = 11 : i64} {
  func.func @molann_kernel(%arg0: i32, %arg1: memref<12x8x128xf32, #tpu.memory_space<vmem>>, %arg2: memref<32x8xf32, #tpu.memory_space<vmem>>, %arg3: memref<8x40xf32, #tpu.memory_space<vmem>>, %arg4: memref<8x1024xf32, #tpu.memory_space<vmem>>, %arg5: memref<40x1024xf32, #tpu.memory_space<vmem>>, %arg6: memref<2x8x128xf32, #tpu.memory_space<vmem>>) attributes {dimension_semantics = [#tpu.dimension_semantics<parallel>], iteration_bounds = array<i64: 2>, scalar_prefetch = 0 : i64, scratch_operands = 2 : i64, tpu.core_type = #tpu.core_type<tc>, window_params = [{transform_indices = @transform_0, window_bounds = array<i64: 12, 8, 128>}, {pipeline_mode = #tpu.pipeline_mode<synchronous>, transform_indices = @transform_1, window_bounds = array<i64: 32, 8>}, {pipeline_mode = #tpu.pipeline_mode<synchronous>, transform_indices = @transform_2, window_bounds = array<i64: 8, 40>}, {transform_indices = @transform_3, window_bounds = array<i64: 8, 1024>}]} {
    %c0 = arith.constant 0 : index
    %c0_0 = arith.constant 0 : index
    %c0_1 = arith.constant 0 : index
    %0 = vector.load %arg1[%c0, %c0_0, %c0_1] : memref<12x8x128xf32, #tpu.memory_space<vmem>>, vector<12x8x128xf32>
    %1 = vector.extract_strided_slice %0 {offsets = [3, 0, 0], sizes = [1, 8, 128], strides = [1, 1, 1]} : vector<12x8x128xf32> to vector<1x8x128xf32>
    %2 = vector.shape_cast %1 : vector<1x8x128xf32> to vector<8x128xf32>
    %3 = vector.extract_strided_slice %0 {offsets = [0, 0, 0], sizes = [1, 8, 128], strides = [1, 1, 1]} : vector<12x8x128xf32> to vector<1x8x128xf32>
    %4 = vector.shape_cast %3 : vector<1x8x128xf32> to vector<8x128xf32>
    %5 = arith.subf %2, %4 : vector<8x128xf32>
    %6 = vector.extract_strided_slice %0 {offsets = [4, 0, 0], sizes = [1, 8, 128], strides = [1, 1, 1]} : vector<12x8x128xf32> to vector<1x8x128xf32>
    %7 = vector.shape_cast %6 : vector<1x8x128xf32> to vector<8x128xf32>
    %8 = vector.extract_strided_slice %0 {offsets = [1, 0, 0], sizes = [1, 8, 128], strides = [1, 1, 1]} : vector<12x8x128xf32> to vector<1x8x128xf32>
    %9 = vector.shape_cast %8 : vector<1x8x128xf32> to vector<8x128xf32>
    %10 = arith.subf %7, %9 : vector<8x128xf32>
    %11 = vector.extract_strided_slice %0 {offsets = [5, 0, 0], sizes = [1, 8, 128], strides = [1, 1, 1]} : vector<12x8x128xf32> to vector<1x8x128xf32>
    %12 = vector.shape_cast %11 : vector<1x8x128xf32> to vector<8x128xf32>
    %13 = vector.extract_strided_slice %0 {offsets = [2, 0, 0], sizes = [1, 8, 128], strides = [1, 1, 1]} : vector<12x8x128xf32> to vector<1x8x128xf32>
    %14 = vector.shape_cast %13 : vector<1x8x128xf32> to vector<8x128xf32>
    %15 = arith.subf %12, %14 : vector<8x128xf32>
    %16 = vector.extract_strided_slice %0 {offsets = [6, 0, 0], sizes = [1, 8, 128], strides = [1, 1, 1]} : vector<12x8x128xf32> to vector<1x8x128xf32>
    %17 = vector.shape_cast %16 : vector<1x8x128xf32> to vector<8x128xf32>
    %18 = vector.extract_strided_slice %0 {offsets = [3, 0, 0], sizes = [1, 8, 128], strides = [1, 1, 1]} : vector<12x8x128xf32> to vector<1x8x128xf32>
    %19 = vector.shape_cast %18 : vector<1x8x128xf32> to vector<8x128xf32>
    %20 = arith.subf %17, %19 : vector<8x128xf32>
    %21 = vector.extract_strided_slice %0 {offsets = [7, 0, 0], sizes = [1, 8, 128], strides = [1, 1, 1]} : vector<12x8x128xf32> to vector<1x8x128xf32>
    %22 = vector.shape_cast %21 : vector<1x8x128xf32> to vector<8x128xf32>
    %23 = vector.extract_strided_slice %0 {offsets = [4, 0, 0], sizes = [1, 8, 128], strides = [1, 1, 1]} : vector<12x8x128xf32> to vector<1x8x128xf32>
    %24 = vector.shape_cast %23 : vector<1x8x128xf32> to vector<8x128xf32>
    %25 = arith.subf %22, %24 : vector<8x128xf32>
    %26 = vector.extract_strided_slice %0 {offsets = [8, 0, 0], sizes = [1, 8, 128], strides = [1, 1, 1]} : vector<12x8x128xf32> to vector<1x8x128xf32>
    %27 = vector.shape_cast %26 : vector<1x8x128xf32> to vector<8x128xf32>
    %28 = vector.extract_strided_slice %0 {offsets = [5, 0, 0], sizes = [1, 8, 128], strides = [1, 1, 1]} : vector<12x8x128xf32> to vector<1x8x128xf32>
    %29 = vector.shape_cast %28 : vector<1x8x128xf32> to vector<8x128xf32>
    %30 = arith.subf %27, %29 : vector<8x128xf32>
    %31 = vector.extract_strided_slice %0 {offsets = [9, 0, 0], sizes = [1, 8, 128], strides = [1, 1, 1]} : vector<12x8x128xf32> to vector<1x8x128xf32>
    %32 = vector.shape_cast %31 : vector<1x8x128xf32> to vector<8x128xf32>
    %33 = vector.extract_strided_slice %0 {offsets = [6, 0, 0], sizes = [1, 8, 128], strides = [1, 1, 1]} : vector<12x8x128xf32> to vector<1x8x128xf32>
    %34 = vector.shape_cast %33 : vector<1x8x128xf32> to vector<8x128xf32>
    %35 = arith.subf %32, %34 : vector<8x128xf32>
    %36 = vector.extract_strided_slice %0 {offsets = [10, 0, 0], sizes = [1, 8, 128], strides = [1, 1, 1]} : vector<12x8x128xf32> to vector<1x8x128xf32>
    %37 = vector.shape_cast %36 : vector<1x8x128xf32> to vector<8x128xf32>
    %38 = vector.extract_strided_slice %0 {offsets = [7, 0, 0], sizes = [1, 8, 128], strides = [1, 1, 1]} : vector<12x8x128xf32> to vector<1x8x128xf32>
    %39 = vector.shape_cast %38 : vector<1x8x128xf32> to vector<8x128xf32>
    %40 = arith.subf %37, %39 : vector<8x128xf32>
    %41 = vector.extract_strided_slice %0 {offsets = [11, 0, 0], sizes = [1, 8, 128], strides = [1, 1, 1]} : vector<12x8x128xf32> to vector<1x8x128xf32>
    %42 = vector.shape_cast %41 : vector<1x8x128xf32> to vector<8x128xf32>
    %43 = vector.extract_strided_slice %0 {offsets = [8, 0, 0], sizes = [1, 8, 128], strides = [1, 1, 1]} : vector<12x8x128xf32> to vector<1x8x128xf32>
    %44 = vector.shape_cast %43 : vector<1x8x128xf32> to vector<8x128xf32>
    %45 = arith.subf %42, %44 : vector<8x128xf32>
    %46 = arith.mulf %10, %30 : vector<8x128xf32>
    %47 = arith.mulf %15, %25 : vector<8x128xf32>
    %48 = arith.subf %46, %47 : vector<8x128xf32>
    %49 = arith.mulf %15, %20 : vector<8x128xf32>
    %50 = arith.mulf %5, %30 : vector<8x128xf32>
    %51 = arith.subf %49, %50 : vector<8x128xf32>
    %52 = arith.mulf %5, %25 : vector<8x128xf32>
    %53 = arith.mulf %10, %20 : vector<8x128xf32>
    %54 = arith.subf %52, %53 : vector<8x128xf32>
    %55 = arith.mulf %25, %45 : vector<8x128xf32>
    %56 = arith.mulf %30, %40 : vector<8x128xf32>
    %57 = arith.subf %55, %56 : vector<8x128xf32>
    %58 = arith.mulf %30, %35 : vector<8x128xf32>
    %59 = arith.mulf %20, %45 : vector<8x128xf32>
    %60 = arith.subf %58, %59 : vector<8x128xf32>
    %61 = arith.mulf %20, %40 : vector<8x128xf32>
    %62 = arith.mulf %25, %35 : vector<8x128xf32>
    %63 = arith.subf %61, %62 : vector<8x128xf32>
    %64 = arith.mulf %48, %57 : vector<8x128xf32>
    %65 = arith.mulf %51, %60 : vector<8x128xf32>
    %66 = arith.addf %64, %65 : vector<8x128xf32>
    %67 = arith.mulf %54, %63 : vector<8x128xf32>
    %68 = arith.addf %66, %67 : vector<8x128xf32>
    %69 = arith.mulf %20, %20 : vector<8x128xf32>
    %70 = arith.mulf %25, %25 : vector<8x128xf32>
    %71 = arith.addf %69, %70 : vector<8x128xf32>
    %72 = arith.mulf %30, %30 : vector<8x128xf32>
    %73 = arith.addf %71, %72 : vector<8x128xf32>
    %74 = math.sqrt %73 : vector<8x128xf32>
    %75 = arith.mulf %48, %35 : vector<8x128xf32>
    %76 = arith.mulf %51, %40 : vector<8x128xf32>
    %77 = arith.addf %75, %76 : vector<8x128xf32>
    %78 = arith.mulf %54, %45 : vector<8x128xf32>
    %79 = arith.addf %77, %78 : vector<8x128xf32>
    %80 = arith.mulf %79, %74 : vector<8x128xf32>
    %81 = arith.mulf %68, %68 : vector<8x128xf32>
    %82 = arith.mulf %80, %80 : vector<8x128xf32>
    %83 = arith.addf %81, %82 : vector<8x128xf32>
    %cst = arith.constant 1.000000e-30 : f32
    %84 = vector.broadcast %cst : f32 to vector<8x128xf32>
    %85 = arith.maximumf %83, %84 : vector<8x128xf32>
    %86 = math.rsqrt %85 : vector<8x128xf32>
    %87 = arith.mulf %68, %86 : vector<8x128xf32>
    %c0_2 = arith.constant 0 : index
    %c0_3 = arith.constant 0 : index
    %c0_4 = arith.constant 0 : index
    %88 = vector.load %arg6[%c0_2, %c0_3, %c0_4] : memref<2x8x128xf32, #tpu.memory_space<vmem>>, vector<1x8x128xf32>
    %89 = vector.shape_cast %88 : vector<1x8x128xf32> to vector<8x128xf32>
    %90 = vector.shape_cast %87 : vector<8x128xf32> to vector<1x8x128xf32>
    tpu.vector_store %arg6[%c0_2, %c0_3, %c0_4], %90 {strides = array<i32>} : memref<2x8x128xf32, #tpu.memory_space<vmem>>, vector<1x8x128xf32>,
    %91 = arith.mulf %80, %86 : vector<8x128xf32>
    %c1 = arith.constant 1 : index
    %c0_5 = arith.constant 0 : index
    %c0_6 = arith.constant 0 : index
    %92 = vector.load %arg6[%c1, %c0_5, %c0_6] : memref<2x8x128xf32, #tpu.memory_space<vmem>>, vector<1x8x128xf32>
    %93 = vector.shape_cast %92 : vector<1x8x128xf32> to vector<8x128xf32>
    %94 = vector.shape_cast %91 : vector<8x128xf32> to vector<1x8x128xf32>
    tpu.vector_store %arg6[%c1, %c0_5, %c0_6], %94 {strides = array<i32>} : memref<2x8x128xf32, #tpu.memory_space<vmem>>, vector<1x8x128xf32>,
    %cst_7 = arith.constant 1.000000e+00 : f32
    %95 = vector.broadcast %cst_7 : f32 to vector<1x1024xf32>
    %c2 = arith.constant 2 : index
    %c0_8 = arith.constant 0 : index
    %96 = vector.load %arg5[%c2, %c0_8] : memref<40x1024xf32, #tpu.memory_space<vmem>>, vector<1x1024xf32>
    tpu.vector_store %arg5[%c2, %c0_8], %95 {strides = array<i32>} : memref<40x1024xf32, #tpu.memory_space<vmem>>, vector<1x1024xf32>,
    %cst_9 = arith.constant 0.000000e+00 : f32
    %97 = vector.broadcast %cst_9 : f32 to vector<5x1024xf32>
    %c3 = arith.constant 3 : index
    %c0_10 = arith.constant 0 : index
    %98 = vector.load %arg5[%c3, %c0_10] : memref<40x1024xf32, #tpu.memory_space<vmem>>, vector<5x1024xf32>
    tpu.vector_store %arg5[%c3, %c0_10], %97 {strides = array<i32>} : memref<40x1024xf32, #tpu.memory_space<vmem>>, vector<5x1024xf32>,
    %c0_11 = arith.constant 0 : index
    %c0_12 = arith.constant 0 : index
    %c0_13 = arith.constant 0 : index
    %99 = vector.load %arg6[%c0_11, %c0_12, %c0_13] : memref<2x8x128xf32, #tpu.memory_space<vmem>>, vector<1x1x128xf32>
    %100 = vector.shape_cast %99 : vector<1x1x128xf32> to vector<1x128xf32>
    %c0_14 = arith.constant 0 : index
    %c0_15 = arith.constant 0 : index
    %101 = vector.load %arg5[%c0_14, %c0_15] : memref<40x1024xf32, #tpu.memory_space<vmem>>, vector<1x128xf32>
    tpu.vector_store %arg5[%c0_14, %c0_15], %100 {strides = array<i32>} : memref<40x1024xf32, #tpu.memory_space<vmem>>, vector<1x128xf32>,
    %c1_16 = arith.constant 1 : index
    %c0_17 = arith.constant 0 : index
    %c0_18 = arith.constant 0 : index
    %102 = vector.load %arg6[%c1_16, %c0_17, %c0_18] : memref<2x8x128xf32, #tpu.memory_space<vmem>>, vector<1x1x128xf32>
    %103 = vector.shape_cast %102 : vector<1x1x128xf32> to vector<1x128xf32>
    %c1_19 = arith.constant 1 : index
    %c0_20 = arith.constant 0 : index
    %104 = vector.load %arg5[%c1_19, %c0_20] : memref<40x1024xf32, #tpu.memory_space<vmem>>, vector<1x128xf32>
    tpu.vector_store %arg5[%c1_19, %c0_20], %103 {strides = array<i32>} : memref<40x1024xf32, #tpu.memory_space<vmem>>, vector<1x128xf32>,
    %c0_21 = arith.constant 0 : index
    %c1_22 = arith.constant 1 : index
    %c0_23 = arith.constant 0 : index
    %105 = vector.load %arg6[%c0_21, %c1_22, %c0_23] : memref<2x8x128xf32, #tpu.memory_space<vmem>>, vector<1x1x128xf32>
    %106 = vector.shape_cast %105 : vector<1x1x128xf32> to vector<1x128xf32>
    %c0_24 = arith.constant 0 : index
    %c128 = arith.constant 128 : index
    %107 = vector.load %arg5[%c0_24, %c128] : memref<40x1024xf32, #tpu.memory_space<vmem>>, vector<1x128xf32>
    tpu.vector_store %arg5[%c0_24, %c128], %106 {strides = array<i32>} : memref<40x1024xf32, #tpu.memory_space<vmem>>, vector<1x128xf32>,
    %c1_25 = arith.constant 1 : index
    %c1_26 = arith.constant 1 : index
    %c0_27 = arith.constant 0 : index
    %108 = vector.load %arg6[%c1_25, %c1_26, %c0_27] : memref<2x8x128xf32, #tpu.memory_space<vmem>>, vector<1x1x128xf32>
    %109 = vector.shape_cast %108 : vector<1x1x128xf32> to vector<1x128xf32>
    %c1_28 = arith.constant 1 : index
    %c128_29 = arith.constant 128 : index
    %110 = vector.load %arg5[%c1_28, %c128_29] : memref<40x1024xf32, #tpu.memory_space<vmem>>, vector<1x128xf32>
    tpu.vector_store %arg5[%c1_28, %c128_29], %109 {strides = array<i32>} : memref<40x1024xf32, #tpu.memory_space<vmem>>, vector<1x128xf32>,
    %c0_30 = arith.constant 0 : index
    %c2_31 = arith.constant 2 : index
    %c0_32 = arith.constant 0 : index
    %111 = vector.load %arg6[%c0_30, %c2_31, %c0_32] : memref<2x8x128xf32, #tpu.memory_space<vmem>>, vector<1x1x128xf32>
    %112 = vector.shape_cast %111 : vector<1x1x128xf32> to vector<1x128xf32>
    %c0_33 = arith.constant 0 : index
    %c256 = arith.constant 256 : index
    %113 = vector.load %arg5[%c0_33, %c256] : memref<40x1024xf32, #tpu.memory_space<vmem>>, vector<1x128xf32>
    tpu.vector_store %arg5[%c0_33, %c256], %112 {strides = array<i32>} : memref<40x1024xf32, #tpu.memory_space<vmem>>, vector<1x128xf32>,
    %c1_34 = arith.constant 1 : index
    %c2_35 = arith.constant 2 : index
    %c0_36 = arith.constant 0 : index
    %114 = vector.load %arg6[%c1_34, %c2_35, %c0_36] : memref<2x8x128xf32, #tpu.memory_space<vmem>>, vector<1x1x128xf32>
    %115 = vector.shape_cast %114 : vector<1x1x128xf32> to vector<1x128xf32>
    %c1_37 = arith.constant 1 : index
    %c256_38 = arith.constant 256 : index
    %116 = vector.load %arg5[%c1_37, %c256_38] : memref<40x1024xf32, #tpu.memory_space<vmem>>, vector<1x128xf32>
    tpu.vector_store %arg5[%c1_37, %c256_38], %115 {strides = array<i32>} : memref<40x1024xf32, #tpu.memory_space<vmem>>, vector<1x128xf32>,
    %c0_39 = arith.constant 0 : index
    %c3_40 = arith.constant 3 : index
    %c0_41 = arith.constant 0 : index
    %117 = vector.load %arg6[%c0_39, %c3_40, %c0_41] : memref<2x8x128xf32, #tpu.memory_space<vmem>>, vector<1x1x128xf32>
    %118 = vector.shape_cast %117 : vector<1x1x128xf32> to vector<1x128xf32>
    %c0_42 = arith.constant 0 : index
    %c384 = arith.constant 384 : index
    %119 = vector.load %arg5[%c0_42, %c384] : memref<40x1024xf32, #tpu.memory_space<vmem>>, vector<1x128xf32>
    tpu.vector_store %arg5[%c0_42, %c384], %118 {strides = array<i32>} : memref<40x1024xf32, #tpu.memory_space<vmem>>, vector<1x128xf32>,
    %c1_43 = arith.constant 1 : index
    %c3_44 = arith.constant 3 : index
    %c0_45 = arith.constant 0 : index
    %120 = vector.load %arg6[%c1_43, %c3_44, %c0_45] : memref<2x8x128xf32, #tpu.memory_space<vmem>>, vector<1x1x128xf32>
    %121 = vector.shape_cast %120 : vector<1x1x128xf32> to vector<1x128xf32>
    %c1_46 = arith.constant 1 : index
    %c384_47 = arith.constant 384 : index
    %122 = vector.load %arg5[%c1_46, %c384_47] : memref<40x1024xf32, #tpu.memory_space<vmem>>, vector<1x128xf32>
    tpu.vector_store %arg5[%c1_46, %c384_47], %121 {strides = array<i32>} : memref<40x1024xf32, #tpu.memory_space<vmem>>, vector<1x128xf32>,
    %c0_48 = arith.constant 0 : index
    %c4 = arith.constant 4 : index
    %c0_49 = arith.constant 0 : index
    %123 = vector.load %arg6[%c0_48, %c4, %c0_49] : memref<2x8x128xf32, #tpu.memory_space<vmem>>, vector<1x1x128xf32>
    %124 = vector.shape_cast %123 : vector<1x1x128xf32> to vector<1x128xf32>
    %c0_50 = arith.constant 0 : index
    %c512 = arith.constant 512 : index
    %125 = vector.load %arg5[%c0_50, %c512] : memref<40x1024xf32, #tpu.memory_space<vmem>>, vector<1x128xf32>
    tpu.vector_store %arg5[%c0_50, %c512], %124 {strides = array<i32>} : memref<40x1024xf32, #tpu.memory_space<vmem>>, vector<1x128xf32>,
    %c1_51 = arith.constant 1 : index
    %c4_52 = arith.constant 4 : index
    %c0_53 = arith.constant 0 : index
    %126 = vector.load %arg6[%c1_51, %c4_52, %c0_53] : memref<2x8x128xf32, #tpu.memory_space<vmem>>, vector<1x1x128xf32>
    %127 = vector.shape_cast %126 : vector<1x1x128xf32> to vector<1x128xf32>
    %c1_54 = arith.constant 1 : index
    %c512_55 = arith.constant 512 : index
    %128 = vector.load %arg5[%c1_54, %c512_55] : memref<40x1024xf32, #tpu.memory_space<vmem>>, vector<1x128xf32>
    tpu.vector_store %arg5[%c1_54, %c512_55], %127 {strides = array<i32>} : memref<40x1024xf32, #tpu.memory_space<vmem>>, vector<1x128xf32>,
    %c0_56 = arith.constant 0 : index
    %c5 = arith.constant 5 : index
    %c0_57 = arith.constant 0 : index
    %129 = vector.load %arg6[%c0_56, %c5, %c0_57] : memref<2x8x128xf32, #tpu.memory_space<vmem>>, vector<1x1x128xf32>
    %130 = vector.shape_cast %129 : vector<1x1x128xf32> to vector<1x128xf32>
    %c0_58 = arith.constant 0 : index
    %c640 = arith.constant 640 : index
    %131 = vector.load %arg5[%c0_58, %c640] : memref<40x1024xf32, #tpu.memory_space<vmem>>, vector<1x128xf32>
    tpu.vector_store %arg5[%c0_58, %c640], %130 {strides = array<i32>} : memref<40x1024xf32, #tpu.memory_space<vmem>>, vector<1x128xf32>,
    %c1_59 = arith.constant 1 : index
    %c5_60 = arith.constant 5 : index
    %c0_61 = arith.constant 0 : index
    %132 = vector.load %arg6[%c1_59, %c5_60, %c0_61] : memref<2x8x128xf32, #tpu.memory_space<vmem>>, vector<1x1x128xf32>
    %133 = vector.shape_cast %132 : vector<1x1x128xf32> to vector<1x128xf32>
    %c1_62 = arith.constant 1 : index
    %c640_63 = arith.constant 640 : index
    %134 = vector.load %arg5[%c1_62, %c640_63] : memref<40x1024xf32, #tpu.memory_space<vmem>>, vector<1x128xf32>
    tpu.vector_store %arg5[%c1_62, %c640_63], %133 {strides = array<i32>} : memref<40x1024xf32, #tpu.memory_space<vmem>>, vector<1x128xf32>,
    %c0_64 = arith.constant 0 : index
    %c6 = arith.constant 6 : index
    %c0_65 = arith.constant 0 : index
    %135 = vector.load %arg6[%c0_64, %c6, %c0_65] : memref<2x8x128xf32, #tpu.memory_space<vmem>>, vector<1x1x128xf32>
    %136 = vector.shape_cast %135 : vector<1x1x128xf32> to vector<1x128xf32>
    %c0_66 = arith.constant 0 : index
    %c768 = arith.constant 768 : index
    %137 = vector.load %arg5[%c0_66, %c768] : memref<40x1024xf32, #tpu.memory_space<vmem>>, vector<1x128xf32>
    tpu.vector_store %arg5[%c0_66, %c768], %136 {strides = array<i32>} : memref<40x1024xf32, #tpu.memory_space<vmem>>, vector<1x128xf32>,
    %c1_67 = arith.constant 1 : index
    %c6_68 = arith.constant 6 : index
    %c0_69 = arith.constant 0 : index
    %138 = vector.load %arg6[%c1_67, %c6_68, %c0_69] : memref<2x8x128xf32, #tpu.memory_space<vmem>>, vector<1x1x128xf32>
    %139 = vector.shape_cast %138 : vector<1x1x128xf32> to vector<1x128xf32>
    %c1_70 = arith.constant 1 : index
    %c768_71 = arith.constant 768 : index
    %140 = vector.load %arg5[%c1_70, %c768_71] : memref<40x1024xf32, #tpu.memory_space<vmem>>, vector<1x128xf32>
    tpu.vector_store %arg5[%c1_70, %c768_71], %139 {strides = array<i32>} : memref<40x1024xf32, #tpu.memory_space<vmem>>, vector<1x128xf32>,
    %c0_72 = arith.constant 0 : index
    %c7 = arith.constant 7 : index
    %c0_73 = arith.constant 0 : index
    %141 = vector.load %arg6[%c0_72, %c7, %c0_73] : memref<2x8x128xf32, #tpu.memory_space<vmem>>, vector<1x1x128xf32>
    %142 = vector.shape_cast %141 : vector<1x1x128xf32> to vector<1x128xf32>
    %c0_74 = arith.constant 0 : index
    %c896 = arith.constant 896 : index
    %143 = vector.load %arg5[%c0_74, %c896] : memref<40x1024xf32, #tpu.memory_space<vmem>>, vector<1x128xf32>
    tpu.vector_store %arg5[%c0_74, %c896], %142 {strides = array<i32>} : memref<40x1024xf32, #tpu.memory_space<vmem>>, vector<1x128xf32>,
    %c1_75 = arith.constant 1 : index
    %c7_76 = arith.constant 7 : index
    %c0_77 = arith.constant 0 : index
    %144 = vector.load %arg6[%c1_75, %c7_76, %c0_77] : memref<2x8x128xf32, #tpu.memory_space<vmem>>, vector<1x1x128xf32>
    %145 = vector.shape_cast %144 : vector<1x1x128xf32> to vector<1x128xf32>
    %c1_78 = arith.constant 1 : index
    %c896_79 = arith.constant 896 : index
    %146 = vector.load %arg5[%c1_78, %c896_79] : memref<40x1024xf32, #tpu.memory_space<vmem>>, vector<1x128xf32>
    tpu.vector_store %arg5[%c1_78, %c896_79], %145 {strides = array<i32>} : memref<40x1024xf32, #tpu.memory_space<vmem>>, vector<1x128xf32>,
    %c0_80 = arith.constant 0 : index
    %c0_81 = arith.constant 0 : index
    %147 = vector.load %arg2[%c0_80, %c0_81] : memref<32x8xf32, #tpu.memory_space<vmem>>, vector<32x8xf32>
    %c0_82 = arith.constant 0 : index
    %c0_83 = arith.constant 0 : index
    %148 = vector.load %arg5[%c0_82, %c0_83] : memref<40x1024xf32, #tpu.memory_space<vmem>>, vector<8x1024xf32>
    %cst_84 = arith.constant dense<0.000000e+00> : vector<32x1024xf32>
    %149 = tpu.matmul %147, %148, %cst_84 {dimension_numbers = #tpu.dot_dimension_numbers<[1], [0], [0], [1], [0, 0, 1, 1], [], []>} : vector<32x8xf32>, vector<8x1024xf32>, vector<32x1024xf32> -> vector<32x1024xf32>
    %150 = math.tanh %149 : vector<32x1024xf32>
    %c8 = arith.constant 8 : index
    %c0_85 = arith.constant 0 : index
    %151 = vector.load %arg5[%c8, %c0_85] : memref<40x1024xf32, #tpu.memory_space<vmem>>, vector<32x1024xf32>
    tpu.vector_store %arg5[%c8, %c0_85], %150 {strides = array<i32>} : memref<40x1024xf32, #tpu.memory_space<vmem>>, vector<32x1024xf32>,
    %c0_86 = arith.constant 0 : index
    %c0_87 = arith.constant 0 : index
    %152 = vector.load %arg3[%c0_86, %c0_87] : memref<8x40xf32, #tpu.memory_space<vmem>>, vector<8x40xf32>
    %c0_88 = arith.constant 0 : index
    %c0_89 = arith.constant 0 : index
    %153 = vector.load %arg5[%c0_88, %c0_89] : memref<40x1024xf32, #tpu.memory_space<vmem>>, vector<40x1024xf32>
    %cst_90 = arith.constant dense<0.000000e+00> : vector<8x1024xf32>
    %154 = tpu.matmul %152, %153, %cst_90 {dimension_numbers = #tpu.dot_dimension_numbers<[1], [0], [0], [1], [0, 0, 1, 1], [], []>} : vector<8x40xf32>, vector<40x1024xf32>, vector<8x1024xf32> -> vector<8x1024xf32>
    %c0_91 = arith.constant 0 : index
    %c0_92 = arith.constant 0 : index
    %155 = vector.load %arg4[%c0_91, %c0_92] : memref<8x1024xf32, #tpu.memory_space<vmem>>, vector<8x1024xf32>
    tpu.vector_store %arg4[%c0_91, %c0_92], %154 {strides = array<i32>} : memref<8x1024xf32, #tpu.memory_space<vmem>>, vector<8x1024xf32>,
    return
  }
  func.func @transform_0(%arg0: i32) -> (i32, i32, i32) {
    %c0_i32 = arith.constant 0 : i32
    %c0_i32_0 = arith.constant 0 : i32
    %c0_i32_1 = arith.constant 0 : i32
    return %c0_i32, %arg0, %c0_i32_0 : i32, i32, i32
  }
  func.func @transform_1(%arg0: i32) -> (i32, i32) {
    %c0_i32 = arith.constant 0 : i32
    %c0_i32_0 = arith.constant 0 : i32
    %c0_i32_1 = arith.constant 0 : i32
    return %c0_i32, %c0_i32_0 : i32, i32
  }
  func.func @transform_2(%arg0: i32) -> (i32, i32) {
    %c0_i32 = arith.constant 0 : i32
    %c0_i32_0 = arith.constant 0 : i32
    %c0_i32_1 = arith.constant 0 : i32
    return %c0_i32, %c0_i32_0 : i32, i32
  }
  func.func @transform_3(%arg0: i32) -> (i32, i32) {
    %c0_i32 = arith.constant 0 : i32
    %c0_i32_0 = arith.constant 0 : i32
    return %c0_i32, %arg0 : i32, i32
  }
}

</mosaic_0001>

<bundles_post_ra>
// kernel: molann_forward.1
= control target key start
LH: loop header
LB: loop body
LE: loop exit
PB: predicated region body
PF: predicated region fallthrough
CT: control target
= control target key end

     0   :  { %s1413_s12 = smov 0   ;;  %s1415_s13 = smov 0   ;;  %s1560_s0 = inlined_call_operand.vmem [shape: f32[12,16,128], index: 0, kind: input, shape index: {}]   ;;  %s1561_s1 = inlined_call_operand.vmem [shape: f32[32,8], index: 1, kind: input, shape index: {}]   ;;  %s1562_s2 = inlined_call_operand.vmem [shape: f32[8,40], index: 2, kind: input, shape index: {}]   ;;  %s1563_s3 = inlined_call_operand.vmem [shape: f32[8,2048], index: 3, kind: output, shape index: {}]  }
   0x1   :  { %s1417_s14 = smov 0  }
   0x2 LB: > { %s1209_s15 = sadd.s32 4294967295, %s1389_s14   ;;  %s1430_s16 = sadd.s32 1, %s1389_s14   ;;  %s1389_s14 = sphi %s1417_s14, %s1566_s14   ;;  %s1385_s13 = sphi %s1415_s13, %s1565_s13   ;;  %s1381_s12 = sphi %s1413_s12, %s1564_s12  }
   0x3   : > { %s17_s17 = ssub.s32 %s1389_s14, %s1430_s16  ;;  %s20_s18 = sadd.s32 1, %s1385_s13 }
   0x4   : > { %p18_p0 = scmp.eq.s32.totalorder %s17_s17, 0  ;;  %p27_p1 = scmp.ne.s32.totalorder %s1385_s13, %s1381_s12 }
   0x5   : > { %p28_p2 = scmp.eq.s32.totalorder %s1389_s14, 0  ;;  %p1212_p4 = scmp.ge.s32.totalorder %s1389_s14, 2 }
   0x6   : > { %s1439_s19 = scalar_select %p18_p0, %s1385_s13, %s20_s18  }
   0x7   : > { %p29_p3 = por %p28_p2, %p27_p1  ;;  %127 = sbr.rel (%p1212_p4) target bundleno = 24 (0x18), region = 24 }
   0xe   : > { %130 = sbr.rel (!%p29_p3) target bundleno = 24 (0x18), region = 28  ;;  %s132_s20 = sand.u32 (%p29_p3), 1, %s1385_s13  }
   0xf   : > { %s1213_s21 = sshll.u32 (%p29_p3), %s1389_s14, 3  ;;  %s1271_s22 = smul.u32 (%p29_p3), 96, %s132_s20 }
  0x10   : > { %s136_s25 = scalar_lea.vmem (%p29_p3), %s1560_s0, %s1213_s21 }
  0x11   : > { %v186_v0 = vld [vmem:[%s136_s25] sm:$0xff] (%p29_p3)  ;;  %v188_v1 = vld [vmem:[%s136_s25 + $0x10] sm:$0xff] (%p29_p3)  ;;  %s134_s26 = scalar_lea.vmem (%p29_p3), [#allocation4], %s1271_s22 }
  0x12   : > { %v190_v2 = vld [vmem:[%s136_s25 + $0x20] sm:$0xff] (%p29_p3)  ;;  %v192_v3 = vld [vmem:[%s136_s25 + $0x30] sm:$0xff] (%p29_p3)  ;;  %187 = vst [vmem:[%s134_s26] sm:$0xff] (%p29_p3), %v186_v0  ;;  %189 = vst [vmem:[%s134_s26 + $0x8] sm:$0xff] (%p29_p3), %v188_v1 }
  0x13   : > { %v194_v4 = vld [vmem:[%s136_s25 + $0x40] sm:$0xff] (%p29_p3)  ;;  %v196_v5 = vld [vmem:[%s136_s25 + $0x50] sm:$0xff] (%p29_p3)  ;;  %191 = vst [vmem:[%s134_s26 + $0x10] sm:$0xff] (%p29_p3), %v190_v2  ;;  %193 = vst [vmem:[%s134_s26 + $0x18] sm:$0xff] (%p29_p3), %v192_v3 }
  0x14   : > { %195 = vst [vmem:[%s134_s26 + $0x20] sm:$0xff] (%p29_p3), %v194_v4  ;;  %197 = vst [vmem:[%s134_s26 + $0x28] sm:$0xff] (%p29_p3), %v196_v5  ;;  %v198_v6 = vld [vmem:[%s136_s25 + $0x60] sm:$0xff] (%p29_p3)  ;;  %v200_v7 = vld [vmem:[%s136_s25 + $0x70] sm:$0xff] (%p29_p3) }
  0x15   : > { %v202_v8 = vld [vmem:[%s136_s25 + $0x80] sm:$0xff]  ;;  %199 = vst [vmem:[%s134_s26 + $0x30] sm:$0xff] %v198_v6  ;;  %201 = vst [vmem:[%s134_s26 + $0x38] sm:$0xff] %v200_v7  ;;  %v204_v9 = vld [vmem:[%s136_s25 + $0x90] sm:$0xff] }
  0x16   : > { %203 = vst [vmem:[%s134_s26 + $0x40] sm:$0xff] %v202_v8  ;;  %v206_v10 = vld [vmem:[%s136_s25 + $0xa0] sm:$0xff]  ;;  %v208_v11 = vld [vmem:[%s136_s25 + $0xb0] sm:$0xff]  ;;  %205 = vst [vmem:[%s134_s26 + $0x48] sm:$0xff] %v204_v9 }
  0x17   : > { %207 = vst [vmem:[%s134_s26 + $0x50] sm:$0xff] %v206_v10  ;;  %209 = vst [vmem:[%s134_s26 + $0x58] sm:$0xff] %v208_v11 }
  0x18 PF: > { %p1214_p5 = scmp.ge.s32.totalorder %s1389_s14, 1  ;;  %p214_p6 = scmp.lt.s32.totalorder %s1389_s14, 3 }
  0x1a   : > { %p215_p7 = pnand %p1214_p5, %p214_p6 }
  0x1b   : > { %s221_s27 = sand.u32 (!%p215_p7), 1, %s1381_s12   ;;  %v1391_v12 = vmov (!%p215_p7), 1.0   ;;  %v1392_v13 = vmov (!%p215_p7), 0.0   ;;  %vm377_vm2 = vcmask (!%p215_p7), 64512   ;;  %vm851_vm3 = vcmask (!%p215_p7), 326656   ;;  %s1215_s17 = sshll.u32 (!%p215_p7), %s1209_s15, 3 }
  0x1c   : > { %218 = sbr.rel (%p215_p7) target bundleno = 573 (0x23d), region = 66  ;;  %323 = vst [vmem:[#allocation2 + $0x2] ss:$8 sm:$0xf] (!%p215_p7), %v1391_v12  ;;  %326 = vst [vmem:[#allocation2 + $0x8] sm:$0xf8] (!%p215_p7), %v1392_v13  ;;  %454 = vmatprep.mubr.f32.mxu0 (!%p215_p7), %v1392_v13  ;;  %543 = vmatprep.mubr.f32.mxu1 (!%p215_p7), %v1392_v13 }
  0x1d   : > { %s1272_s28 = smul.u32 (!%p215_p7), 96, %s221_s27  ;;  %324 = vst [vmem:[#allocation2 + $0x2] ss:$8 sm:$0xf0] (!%p215_p7), %v1391_v12  ;;  %325 = vst [vmem:[#allocation2] sm:$0xf8] (!%p215_p7), %v1392_v13 }
  0x1e   : > { %327 = vst [vmem:[#allocation2 + $0x10] sm:$0xf8] (!%p215_p7), %v1392_v13  ;;  %328 = vst [vmem:[#allocation2 + $0x18] sm:$0xf8] (!%p215_p7), %v1392_v13  ;;  %p245_p8 = scmp.lt.s32.totalorder (!%p215_p7), %s1215_s17, 15 }
  0x1f   : > { %329 = vst [vmem:[#allocation2 + $0x20] sm:$0xf8] (!%p215_p7), %v1392_v13  ;;  %330 = vst [vmem:[#allocation2 + $0x28] sm:$0xf8] (!%p215_p7), %v1392_v13  ;;  %s223_s29 = scalar_lea.vmem (!%p215_p7), [#allocation4], %s1272_s28 }
  0x20   : > { %331 = vst [vmem:[#allocation2 + $0x30] sm:$0xf8] (!%p215_p7), %v1392_v13  ;;  %332 = vst [vmem:[#allocation2 + $0x38] sm:$0xf8] (!%p215_p7), %v1392_v13  ;;  %v250_v14 = vld [vmem:[%s223_s29] sm:$0xff] (!%p215_p7)  ;;  %v251_v15 = vld [vmem:[%s223_s29 + $0x8] sm:$0xff] (!%p215_p7) }
  0x21   : > { %v252_v16 = vld [vmem:[%s223_s29 + $0x10] sm:$0xff] (!%p215_p7)  ;;  %v253_v17 = vld [vmem:[%s223_s29 + $0x18] sm:$0xff] (!%p215_p7)  ;;  %v254_v18 = vld [vmem:[%s223_s29 + $0x20] sm:$0xff] (!%p215_p7) }
  0x22   : > { %v255_v19 = vld [vmem:[%s223_s29 + $0x28] sm:$0xff] (!%p215_p7)  ;;  %v256_v20 = vld [vmem:[%s223_s29 + $0x30] sm:$0xff] (!%p215_p7)  ;;  %v257_v21 = vld [vmem:[%s223_s29 + $0x38] sm:$0xff] (!%p215_p7)  ;;  %v263_v26 = vsub.f32 (!%p215_p7), %v254_v18, %v251_v15  ;;  %v262_v28 = vsub.f32 (!%p215_p7), %v253_v17, %v250_v14 }
  0x23   : > { %v258_v22 = vld [vmem:[%s223_s29 + $0x40] sm:$0xff]  ;;  %v259_v23 = vld [vmem:[%s223_s29 + $0x48] sm:$0xff]  ;;  %v260_v24 = vld [vmem:[%s223_s29 + $0x50] sm:$0xff]  ;;  %v264_v27 = vsub.f32 %v255_v19, %v252_v16  ;;  %v265_v29 = vsub.f32 %v256_v20, %v253_v17  ;;  %v266_v30 = vsub.f32 %v257_v21, %v254_v18  ;;  %s1568_s17 = smov (!%p245_p8, %s1215_s17), 15 }
  0x24   : > { %v261_v25 = vld [vmem:[%s223_s29 + $0x58] sm:$0xff]  ;;  %v267_v31 = vsub.f32 %v258_v22, %v255_v19  ;;  %v268_v32 = vsub.f32 %v259_v23, %v256_v20  ;;  %v269_v33 = vsub.f32 %v260_v24, %v257_v21  ;;  %s1216_s18 = sshll.u32 %s1568_s17, 3 }
  0x25   : > { %v270_v34 = vsub.f32 %v261_v25, %v258_v22  ;;  %v272_v36 = vmul.f32 %v266_v30, %v264_v27  ;;  %v274_v37 = vmul.f32 %v265_v29, %v264_v27  ;;  %v294_v39 = vmul.f32 %v265_v29, %v265_v29  ;;  %s248_s22 = scalar_lea.vmem %s1563_s3, %s1216_s18 }
  0x26   : > { %v271_v35 = vmul.f32 %v267_v31, %v263_v26  ;;  %v275_v38 = vmul.f32 %v267_v31, %v262_v28  ;;  %v295_v40 = vmul.f32 %v266_v30, %v266_v30  ;;  %v297_v41 = vmul.f32 %v267_v31, %v267_v31 }
  0x27   : > { %v280_v42 = vmul.f32 %v270_v34, %v266_v30  ;;  %v281_v43 = vmul.f32 %v269_v33, %v267_v31  ;;  %v283_v44 = vmul.f32 %v268_v32, %v267_v31  ;;  %v284_v45 = vmul.f32 %v270_v34, %v265_v29 }
  0x28   : > { %v296_v46 = vadd.f32 %v295_v40, %v294_v39  ;;  %v277_v47 = vmul.f32 %v266_v30, %v262_v28  ;;  %v278_v48 = vmul.f32 %v265_v29, %v263_v26  ;;  %v286_v49 = vmul.f32 %v269_v33, %v265_v29 }
  0x29   : > { %v287_v50 = vmul.f32 %v268_v32, %v266_v30  ;;  %v273_v52 = vsub.f32 %v271_v35, %v272_v36  ;;  %v276_v53 = vsub.f32 %v274_v37, %v275_v38  ;;  %v282_v54 = vsub.f32 %v280_v42, %v281_v43  ;;  %v365_v35 = vld [vmem:[%s1561_s1] sm:$0xff]  ;;  %v366_v42 = vld [vmem:[%s1561_s1 + $0x8] sm:$0xff] }
  0x2a   : > { %v298_v51 = vadd.f32 %v297_v41, %v296_v46  ;;  %v285_v55 = vsub.f32 %v283_v44, %v284_v45  ;;  %v279_v56 = vsub.f32 %v277_v47, %v278_v48  ;;  %v367_v44 = vld [vmem:[%s1561_s1 + $0x10] sm:$0xff]  ;;  %v368_v45 = vld [vmem:[%s1561_s1 + $0x18] sm:$0xff] }
  0x2b   : > { %v288_v57 = vsub.f32 %v286_v49, %v287_v50  ;;  %v289_v58 = vmul.f32 %v282_v54, %v273_v52  ;;  %v306_v60 = vmul.f32 %v273_v52, %v268_v32  ;;  %v307_v61 = vmul.f32 %v276_v53, %v269_v33 }
  0x2c   : > { %1299 = vrsqrt.f32 %v298_v51  ;;  %v290_v59 = vmul.f32 %v285_v55, %v276_v53  ;;  %v309_v1 = vmul.f32 %v279_v56, %v270_v34  ;;  %vm301_vm0 = vcmp.eq.f32.partialorder %v298_v51, inf }
  0x2d   : > { %v292_v63 = vmul.f32 %v288_v57, %v279_v56  ;;  %v308_v0 = vadd.f32 %v307_v61, %v306_v60  ;;  %v304_v3 = vand.u32 2147483648, %v298_v51  ;;  %vm303_vm1 = vcmp.eq.f32.partialorder %v298_v51, 0.0 }
  0x2e   : > { %v291_v62 = vadd.f32 %v290_v59, %v289_v58 }
  0x2f   : > { %v310_v6 = vadd.f32 %v309_v1, %v308_v0 }
  0x30   : > { %v293_v4 = vadd.f32 %v292_v63, %v291_v62 }
  0x32   : > { %v312_v10 = vmul.f32 %v293_v4, %v293_v4 }
  0x36   : > { %v1300_v2 = vpop.eup %1299 }
  0x37   : > { %v300_v5 = vmul.f32 %v1300_v2, %v298_v51 }
  0x39   : > { %v302_v7 = vsel %vm301_vm0, %v298_v51, %v300_v5 }
  0x3a   : > { %v305_v8 = vsel %vm303_vm1, %v304_v3, %v302_v7 }
  0x3b   : > { %v311_v9 = vmul.f32 %v310_v6, %v305_v8 }
  0x3d   : > { %v313_v11 = vmul.f32 %v311_v9, %v311_v9 }
  0x3f   : > { %v314_v12 = vadd.f32 %v313_v11, %v312_v10 }
  0x41   : > { %v315_v14 = vmax.f32 %v314_v12, 1e-30 }
  0x43   : > { %1301 = vrsqrt.f32 %v315_v14 }
  0x4d   : > { %v1302_v15 = vpop.eup %1301 }
  0x4e   : > { %v317_v16 = vmul.f32 %v1302_v15, %v293_v4  ;;  %v319_v17 = vmul.f32 %v1302_v15, %v311_v9 }
  0x50   : > { %318 = vst [vmem:[#allocation3] sm:$0xff] %v317_v16  ;;  %321 = vst [vmem:[#allocation3 + $0x8] sm:$0xff] %v319_v17 }
  0x57   : > { %v337_v18 = vld [vmem:[#allocation3 + $0x1] sm:$0x1]  ;;  %v339_v19 = vld [vmem:[#allocation3 + $0x9] sm:$0x1]  ;;  %v345_v20 = vld [vmem:[#allocation3 + $0x3] sm:$0x1] }
  0x58   : > { %338 = vst [vmem:[#allocation2 + $0x8] sm:$0x1] %v337_v18  ;;  %340 = vst [vmem:[#allocation2 + $0x9] sm:$0x1] %v339_v19  ;;  %v347_v21 = vld [vmem:[#allocation3 + $0xb] sm:$0x1] }
  0x59   : > { %346 = vst [vmem:[#allocation2 + $0x18] sm:$0x1] %v345_v20  ;;  %v333_v22 = vld [vmem:[#allocation3] sm:$0x1]  ;;  %v335_v23 = vld [vmem:[#allocation3 + $0x8] sm:$0x1] }
  0x5a   : > { %348 = vst [vmem:[#allocation2 + $0x19] sm:$0x1] %v347_v21  ;;  %334 = vst [vmem:[#allocation2] sm:$0x1] %v333_v22  ;;  %v341_v24 = vld [vmem:[#allocation3 + $0x2] sm:$0x1] }
  0x5b   : > { %336 = vst [vmem:[#allocation2 + $0x1] sm:$0x1] %v335_v23  ;;  %v343_v25 = vld [vmem:[#allocation3 + $0xa] sm:$0x1]  ;;  %v353_v26 = vld [vmem:[#allocation3 + $0x5] sm:$0x1] }
  0x5c   : > { %342 = vst [vmem:[#allocation2 + $0x10] sm:$0x1] %v341_v24  ;;  %344 = vst [vmem:[#allocation2 + $0x11] sm:$0x1] %v343_v25  ;;  %v355_v27 = vld [vmem:[#allocation3 + $0xd] sm:$0x1] }
  0x5d   : > { %354 = vst [vmem:[#allocation2 + $0x28] sm:$0x1] %v353_v26  ;;  %v361_v28 = vld [vmem:[#allocation3 + $0x7] sm:$0x1]  ;;  %v363_v29 = vld [vmem:[#allocation3 + $0xf] sm:$0x1] }
  0x5e   : > { %356 = vst [vmem:[#allocation2 + $0x29] sm:$0x1] %v355_v27  ;;  %362 = vst [vmem:[#allocation2 + $0x38] sm:$0x1] %v361_v28  ;;  %v349_v30 = vld [vmem:[#allocation3 + $0x4] sm:$0x1] }
  0x5f   : > { %364 = vst [vmem:[#allocation2 + $0x39] sm:$0x1] %v363_v29  ;;  %v351_v31 = vld [vmem:[#allocation3 + $0xc] sm:$0x1]  ;;  %v357_v32 = vld [vmem:[#allocation3 + $0x6] sm:$0x1] }
  0x60   : > { %350 = vst [vmem:[#allocation2 + $0x20] sm:$0x1] %v349_v30  ;;  %352 = vst [vmem:[#allocation2 + $0x21] sm:$0x1] %v351_v31  ;;  %v359_v33 = vld [vmem:[#allocation3 + $0xe] sm:$0x1] }
  0x61   : > { %358 = vst [vmem:[#allocation2 + $0x30] sm:$0x1] %v357_v32  ;;  %360 = vst [vmem:[#allocation2 + $0x31] sm:$0x1] %v359_v33  ;;  %v1460_v34 = vld [vmem:[#allocation2 + $0x8] sm:$0xff]  ;;  %v1466_v36 = vld [vmem:[#allocation2 + $0x18] sm:$0xff] }
  0x62   : > { %390 = vmatprep.subr.mxu0 %v1460_v34  ;;  %v1468_v37 = vld [vmem:[#allocation2] sm:$0xff]  ;;  %479 = vmatprep.subr.mxu1 %v1466_v36 }
  0x63   : > { %391 = vmatpush1.msra.mxu0 %v1468_v37  ;;  %v1472_v38 = vld [vmem:[#allocation2 + $0x10] sm:$0xff] }
  0x64   : > { %480 = vmatpush1.msra.mxu1 %v1472_v38  ;;  %1217 = vmatmul.mubr.msk.f32.vlgmr.msra.gmra.mrb[0].mxu0 %vm377_vm2, %v365_v35 }
  0x65   : > { %v1476_v39 = vld [vmem:[#allocation2 + $0x28] sm:$0xff]  ;;  %1221 = vmatmul.mubr.msk.f32.vlgmr.msra.gmra.mrb[0].mxu1 %vm377_vm2, %v365_v35  ;;  %460 = vmatprep.mubr.f32.mxu0 %v1392_v13 }
  0x66   : > { %v1478_v40 = vld [vmem:[#allocation2 + $0x38] sm:$0xff]  ;;  %568 = vmatprep.subr.mxu0 %v1476_v39  ;;  %549 = vmatprep.mubr.f32.mxu1 %v1392_v13 }
  0x67   : > { %v1482_v41 = vld [vmem:[#allocation2 + $0x20] sm:$0xff]  ;;  %657 = vmatprep.subr.mxu1 %v1478_v40 }
  0x68   : > { %569 = vmatpush1.msra.mxu0 %v1482_v41  ;;  %v1489_v43 = vld [vmem:[#allocation2 + $0x30] sm:$0xff] }
  0x69   : > { %658 = vmatpush1.msra.mxu1 %v1489_v43  ;;  %1218 = vmatmul.mubr.msk.f32.gmra.mrb[2].mxu0 %vm377_vm2, %v366_v42 }
  0x6a   : > { %1222 = vmatmul.mubr.msk.f32.gmra.mrb[2].mxu1 %vm377_vm2, %v366_v42  ;;  %466 = vmatprep.mubr.f32.mxu0 %v1392_v13 }
  0x6b   : > { %555 = vmatprep.mubr.f32.mxu1 %v1392_v13 }
  0x6d   : > { %1219 = vmatmul.mubr.msk.f32.gmra.mrb[4].mxu0 %vm377_vm2, %v367_v44 }
  0x6e   : > { %1223 = vmatmul.mubr.msk.f32.gmra.mrb[4].mxu1 %vm377_vm2, %v367_v44  ;;  %472 = vmatprep.mubr.f32.mxu0 %v1392_v13 }
  0x6f   : > { %561 = vmatprep.mubr.f32.mxu1 %v1392_v13 }
  0x71   : > { %1220 = vmatmul.mubr.msk.f32.gmra.mrb[6].mxu0 %vm377_vm2, %v368_v45 }
  0x72   : > { %1224 = vmatmul.mubr.msk.f32.gmra.mrb[6].mxu1 %vm377_vm2, %v368_v45  ;;  %632 = vmatprep.mubr.f32.mxu0 %v1392_v13 }
  0x73   : > { %721 = vmatprep.mubr.f32.mxu1 %v1392_v13 }
  0x75   : > { %1225 = vmatmul.mubr.msk.f32.vlgmr.msra.gmra.mrb[8].mxu0 %vm377_vm2, %v365_v35 }
  0x76   : > { %1229 = vmatmul.mubr.msk.f32.vlgmr.msra.gmra.mrb[8].mxu1 %vm377_vm2, %v365_v35  ;;  %638 = vmatprep.mubr.f32.mxu0 %v1392_v13 }
  0x77   : > { %727 = vmatprep.mubr.f32.mxu1 %v1392_v13 }
  0x79   : > { %1226 = vmatmul.mubr.msk.f32.gmra.mrb[10].mxu0 %vm377_vm2, %v366_v42 }
  0x7a   : > { %1230 = vmatmul.mubr.msk.f32.gmra.mrb[10].mxu1 %vm377_vm2, %v366_v42  ;;  %644 = vmatprep.mubr.f32.mxu0 %v1392_v13 }
  0x7b   : > { %733 = vmatprep.mubr.f32.mxu1 %v1392_v13 }
  0x7d   : > { %1227 = vmatmul.mubr.msk.f32.gmra.mrb[12].mxu0 %vm377_vm2, %v367_v44 }
  0x7e   : > { %1231 = vmatmul.mubr.msk.f32.gmra.mrb[12].mxu1 %vm377_vm2, %v367_v44  ;;  %650 = vmatprep.mubr.f32.mxu0 %v1392_v13 }
  0x7f   : > { %739 = vmatprep.mubr.f32.mxu1 %v1392_v13 }
  0x81   : > { %1228 = vmatmul.mubr.msk.f32.gmra.mrb[14].mxu0 %vm377_vm2, %v368_v45 }
  0x82   : > { %1232 = vmatmul.mubr.msk.f32.gmra.mrb[14].mxu1 %vm377_vm2, %v368_v45  ;;  %919 = vmatprep.mubr.f32.mxu0 %v1392_v13 }
  0x83   : > { %990 = vmatprep.mubr.f32.mxu1 %v1392_v13 }
 0x137   : > { %v456_v46 = vpop.f32.mrb[0].mxu0 }
 0x138   : > { %1303 = vtanh.f32 %v456_v46  ;;  %v545_v47 = vpop.f32.mrb[0].mxu1  ;;  %v458_v48 = vpop.f32.mrb[1].mxu0 }
 0x139   : > { %1305 = vtanh.f32 %v545_v47  ;;  %v547_v49 = vpop.f32.mrb[1].mxu1 }
 0x13a   : > { %1307 = vtanh.f32 %v458_v48 }
 0x13b   : > { %1309 = vtanh.f32 %v547_v49 }
 0x13c   : > { %v462_v50 = vpop.f32.mrb[2].mxu0 }
 0x13d   : > { %1311 = vtanh.f32 %v462_v50  ;;  %v551_v51 = vpop.f32.mrb[2].mxu1  ;;  %v464_v52 = vpop.f32.mrb[3].mxu0 }
 0x13e   : > { %1313 = vtanh.f32 %v551_v51  ;;  %v553_v53 = vpop.f32.mrb[3].mxu1 }
 0x13f   : > { %1315 = vtanh.f32 %v464_v52 }
 0x140   : > { %1317 = vtanh.f32 %v553_v53  ;;  %v468_v54 = vpop.f32.mrb[4].mxu0 }
 0x141   : > { %1319 = vtanh.f32 %v468_v54  ;;  %v557_v55 = vpop.f32.mrb[4].mxu1  ;;  %v470_v56 = vpop.f32.mrb[5].mxu0 }
 0x142   : > { %1321 = vtanh.f32 %v557_v55  ;;  %v559_v57 = vpop.f32.mrb[5].mxu1  ;;  %v1304_v58 = vpop.eup %1303 }
 0x143   : > { %1323 = vtanh.f32 %v470_v56  ;;  %v1306_v59 = vpop.eup %1305  ;;  %v1241_v5 = vpack.c.bf16 %v1304_v58, %v1468_v37 }
 0x144   : > { %1325 = vtanh.f32 %v559_v57  ;;  %v474_v60 = vpop.f32.mrb[6].mxu0  ;;  %v1308_v61 = vpop.eup %1307  ;;  %v1249_v8 = vpack.c.bf16 %v1306_v59, %v1472_v38 }
 0x145   : > { %1327 = vtanh.f32 %v474_v60  ;;  %v563_v62 = vpop.f32.mrb[6].mxu1  ;;  %v476_v63 = vpop.f32.mrb[7].mxu0  ;;  %v1239_v2 = vpack.c.bf16 %v1308_v61, %v1460_v34 }
 0x146   : > { %v1310_v0 = vpop.eup %1309  ;;  %1329 = vtanh.f32 %v563_v62  ;;  %v565_v1 = vpop.f32.mrb[7].mxu1 }
 0x147   : > { %v1312_v3 = vpop.eup %1311  ;;  %1331 = vtanh.f32 %v476_v63  ;;  %v1247_v4 = vpack.c.bf16 %v1310_v0, %v1466_v36  ;;  %1240 = vmatprep.subr.bf16.mxu0 %v1239_v2  ;;  %v810_v36 = vld [vmem:[%s1562_s2] sm:$0xff] }
 0x148   : > { %v1314_v6 = vpop.eup %1313  ;;  %1333 = vtanh.f32 %v565_v1  ;;  %v634_v7 = vpop.f32.mrb[8].mxu0  ;;  %1242 = vmatpush1.bf16.msra.mxu0 %v1241_v5 }
 0x149   : > { %v1316_v9 = vpop.eup %1315  ;;  %1335 = vtanh.f32 %v634_v7  ;;  %v723_v10 = vpop.f32.mrb[8].mxu1  ;;  %1248 = vmatprep.subr.bf16.mxu1 %v1247_v4 }
 0x14a   : > { %v636_v11 = vpop.f32.mrb[9].mxu0  ;;  %v1318_v12 = vpop.eup %1317  ;;  %1337 = vtanh.f32 %v723_v10  ;;  %1250 = vmatpush1.bf16.msra.mxu1 %v1249_v8 }
 0x14b   : > { %v725_v14 = vpop.f32.mrb[9].mxu1  ;;  %v1320_v15 = vpop.eup %1319  ;;  %1339 = vtanh.f32 %v636_v11 }
 0x14c   : > { %v1322_v16 = vpop.eup %1321  ;;  %1341 = vtanh.f32 %v725_v14  ;;  %v640_v17 = vpop.f32.mrb[10].mxu0  ;;  %v1245_v18 = vpack.c.bf16 %v1320_v15, %v1312_v3 }
 0x14d   : > { %v1324_v19 = vpop.eup %1323  ;;  %1343 = vtanh.f32 %v640_v17  ;;  %v729_v20 = vpop.f32.mrb[10].mxu1  ;;  %v1253_v22 = vpack.c.bf16 %v1322_v16, %v1314_v6 }
 0x14e   : > { %v642_v21 = vpop.f32.mrb[11].mxu0  ;;  %v1326_v23 = vpop.eup %1325  ;;  %1345 = vtanh.f32 %v729_v20  ;;  %v1243_v25 = vpack.c.bf16 %v1324_v19, %v1316_v9 }
 0x14f   : > { %v731_v24 = vpop.f32.mrb[11].mxu1  ;;  %v1328_v26 = vpop.eup %1327  ;;  %1347 = vtanh.f32 %v642_v21  ;;  %v1251_v27 = vpack.c.bf16 %v1326_v23, %v1318_v12 }
 0x150   : > { %v1330_v28 = vpop.eup %1329  ;;  %1349 = vtanh.f32 %v731_v24  ;;  %v646_v29 = vpop.f32.mrb[12].mxu0  ;;  %1244 = vmatprep.subr.bf16.mxu0 %v1243_v25 }
 0x151   : > { %v1332_v30 = vpop.eup %1331  ;;  %1351 = vtanh.f32 %v646_v29  ;;  %v735_v31 = vpop.f32.mrb[12].mxu1  ;;  %1252 = vmatprep.subr.bf16.mxu1 %v1251_v27  ;;  %1246 = vmatpush1.bf16.msra.mxu0 %v1245_v18 }
 0x152   : > { %v648_v32 = vpop.f32.mrb[13].mxu0  ;;  %v1334_v33 = vpop.eup %1333  ;;  %1353 = vtanh.f32 %v735_v31  ;;  %1254 = vmatpush1.bf16.msra.mxu1 %v1253_v22  ;;  %863 = vmatprep.subr.mxu0 %v1332_v30 }
 0x153   : > { %v737_v34 = vpop.f32.mrb[13].mxu1  ;;  %v1336_v35 = vpop.eup %1335  ;;  %1355 = vtanh.f32 %v648_v32  ;;  %934 = vmatprep.subr.mxu1 %v1334_v33 }
 0x154   : > { %v1338_v37 = vpop.eup %1337  ;;  %1357 = vtanh.f32 %v737_v34  ;;  %v652_v38 = vpop.f32.mrb[14].mxu0  ;;  %v1257_v51 = vpack.c.bf16 %v1336_v35, %v1482_v41 }
 0x155   : > { %v1340_v42 = vpop.eup %1339  ;;  %1359 = vtanh.f32 %v652_v38  ;;  %v741_v44 = vpop.f32.mrb[14].mxu1  ;;  %864 = vmatpush1.msra.mxu0 %v1328_v26  ;;  %v1265_v53 = vpack.c.bf16 %v1338_v37, %v1489_v43 }
 0x156   : > { %v654_v45 = vpop.f32.mrb[15].mxu0  ;;  %v1342_v46 = vpop.eup %1341  ;;  %1361 = vtanh.f32 %v741_v44  ;;  %935 = vmatpush1.msra.mxu1 %v1330_v28  ;;  %v1255_v48 = vpack.c.bf16 %v1340_v42, %v1476_v39  ;;  %1233 = vmatmul.mubr.msk.f32.vlgmr.msra.gmra.mrb[16].mxu0 %vm851_vm3, %v810_v36 }
 0x157   : > { %v743_v47 = vpop.f32.mrb[15].mxu1  ;;  %v1344_v49 = vpop.eup %1343  ;;  %1363 = vtanh.f32 %v654_v45  ;;  %v1263_v50 = vpack.c.bf16 %v1342_v46, %v1478_v40  ;;  %1234 = vmatmul.mubr.msk.f32.vlgmr.msra.gmra.mrb[16].mxu1 %vm851_vm3, %v810_v36  ;;  %1061 = vmatprep.mubr.f32.mxu0 %v1392_v13 }
 0x158   : > { %v1346_v52 = vpop.eup %1345  ;;  %1365 = vtanh.f32 %v743_v47  ;;  %1256 = vmatprep.subr.bf16.mxu0 %v1255_v48  ;;  %1132 = vmatprep.mubr.f32.mxu1 %v1392_v13 }
 0x159   : > { %v1348_v39 = vpop.eup %1347  ;;  %1264 = vmatprep.subr.bf16.mxu1 %v1263_v50  ;;  %1258 = vmatpush1.bf16.msra.mxu0 %v1257_v51 }
 0x15a   : > { %v1350_v54 = vpop.eup %1349  ;;  %1266 = vmatpush1.bf16.msra.mxu1 %v1265_v53 }
 0x15b   : > { %v1352_v55 = vpop.eup %1351 }
 0x15c   : > { %v1354_v40 = vpop.eup %1353  ;;  %v1261_v56 = vpack.c.bf16 %v1352_v55, %v1344_v49 }
 0x15d   : > { %v1356_v57 = vpop.eup %1355  ;;  %v1269_v58 = vpack.c.bf16 %v1354_v40, %v1346_v52 }
 0x15e   : > { %v1358_v41 = vpop.eup %1357  ;;  %v1259_v59 = vpack.c.bf16 %v1356_v57, %v1348_v39 }
 0x15f   : > { %v1360_v60 = vpop.eup %1359  ;;  %v1267_v61 = vpack.c.bf16 %v1358_v41, %v1350_v54 }
 0x160   : > { %v1362_v62 = vpop.eup %1361  ;;  %1260 = vmatprep.subr.bf16.mxu0 %v1259_v59 }
 0x161   : > { %v1364_v43 = vpop.eup %1363  ;;  %1268 = vmatprep.subr.bf16.mxu1 %v1267_v61  ;;  %1262 = vmatpush1.bf16.msra.mxu0 %v1261_v56 }
 0x162   : > { %v1366_v13 = vpop.eup %1365  ;;  %1270 = vmatpush1.bf16.msra.mxu1 %v1269_v58  ;;  %1005 = vmatprep.subr.mxu0 %v1364_v43 }
 0x163   : > { %1076 = vmatprep.subr.mxu1 %v1366_v13 }
 0x165   : > { %1006 = vmatpush1.msra.mxu0 %v1360_v60 }
 0x166   : > { %1077 = vmatpush1.msra.mxu1 %v1362_v62  ;;  %1235 = vmatmul.mubr.msk.f32.vlgmr.msra.gmra.mrb[18].mxu0 %vm851_vm3, %v810_v36 }
 0x167   : > { %1236 = vmatmul.mubr.msk.f32.vlgmr.msra.gmra.mrb[18].mxu1 %vm851_vm3, %v810_v36 }
 0x229   : > { %v921_v63 = vpop.f32.mrb[16].mxu0 }
 0x22a   : > { %1139 = vst [vmem:[%s248_s22] sm:$0xff] %v921_v63  ;;  %v992_v0 = vpop.f32.mrb[16].mxu1  ;;  %v923_v1 = vpop.f32.mrb[17].mxu0 }
 0x22b   : > { %1141 = vst [vmem:[%s248_s22 + $0x10] sm:$0xff] %v992_v0  ;;  %1140 = vst [vmem:[%s248_s22 + $0x8] sm:$0xff] %v923_v1  ;;  %v994_v2 = vpop.f32.mrb[17].mxu1 }
 0x22c   : > { %1142 = vst [vmem:[%s248_s22 + $0x18] sm:$0xff] %v994_v2 }
 0x239   : > { %v1063_v3 = vpop.f32.mrb[18].mxu0 }
 0x23a   : > { %1143 = vst [vmem:[%s248_s22 + $0x20] sm:$0xff] %v1063_v3  ;;  %v1134_v4 = vpop.f32.mrb[18].mxu1  ;;  %v1065_v5 = vpop.f32.mrb[19].mxu0 }
 0x23b   : > { %1145 = vst [vmem:[%s248_s22 + $0x30] sm:$0xff] %v1134_v4  ;;  %1144 = vst [vmem:[%s248_s22 + $0x28] sm:$0xff] %v1065_v5  ;;  %v1136_v6 = vpop.f32.mrb[19].mxu1 }
 0x23c   : > { %1146 = vst [vmem:[%s248_s22 + $0x38] sm:$0xff] %v1136_v6 }
 0x23d PF: > { %p10_p9 = scmp.ge.s32.totalorder %s1430_s16, 4   ;;  %s1564_s12 = smov %s1385_s13 }
 0x23e   : > { %s1565_s13 = smov %s1439_s19  ;;  %s1566_s14 = smov %s1430_s16 }
 0x23f   :  { %12 = sbr.rel (!%p10_p9) target bundleno = 2 (0x2), region = 107 }

</bundles_post_ra>
